<compile_context>
chip_gen: v6e
topology: v6e:2x2x1
jax: 0.10.0
libtpu: 0.0.40
codegen_flags: <defaults>
</compile_context>

<pallas_src>
from collections import abc

import jax
import jax.numpy as jnp
from jax.experimental import pallas as pl
from jax.experimental.pallas import tpu as pltpu


# ----------------------------------------------------------------------------
# Fused Linear -> ReLU -> Linear Pallas kernel (Identity fused into the store)
# ----------------------------------------------------------------------------
def _mlp_kernel(x_ref, w1_ref, b1_ref, w2_ref, b2_ref, o_ref):
    # x:(TM,K) f32, w1:(K,H) bf16, b1:(1,H) f32, w2:(H,C) bf16, b2:(1,C) f32
    x = x_ref[...].astype(jnp.bfloat16)            # in-register cast -> MXU path
    h = jnp.dot(x, w1_ref[...], preferred_element_type=jnp.float32)
    h = jnp.maximum(h + b1_ref[...], 0.0)          # f32 epilogue (v5e-safe)
    h = h.astype(jnp.bfloat16)                     # bf16 back into the MXU
    o = jnp.dot(h, w2_ref[...], preferred_element_type=jnp.float32) + b2_ref[...]
    # _OutputIdentityOp fused here: the lane-dense f32 store *is* the Identity.
    o_ref[...] = o.astype(o_ref.dtype)


def mlp_forward(x, w1, b1, w2, b2, *, tm=128):
    """relu(x @ w1 + b1) @ w2 + b2 in one Pallas kernel, batch-tiled grid."""
    B, K = x.shape
    H = w1.shape[1]
    C = w2.shape[1]
    if B % tm != 0:
        tm = B  # fall back to a single batch tile for odd batch sizes

    grid = (B // tm,)
    # TODO(synk): for large hidden/input sizes add a K-reduction grid axis with
    # a VMEM f32 accumulator (and size tiles against v7x's 64 MiB VMEM); at
    # these sizes the weights are fully VMEM-resident so it is unnecessary.
    return pl.pallas_call(
        _mlp_kernel,
        out_shape=jax.ShapeDtypeStruct((B, C), jnp.float32),
        grid=grid,
        in_specs=[
            pl.BlockSpec((tm, K), lambda i: (i, 0)),   # activations: tiled on batch
            pl.BlockSpec((K, H), lambda i: (0, 0)),    # weights: VMEM-resident
            pl.BlockSpec((1, H), lambda i: (0, 0)),
            pl.BlockSpec((H, C), lambda i: (0, 0)),
            pl.BlockSpec((1, C), lambda i: (0, 0)),
        ],
        out_specs=pl.BlockSpec((tm, C), lambda i: (i, 0)),
        compiler_params=pltpu.CompilerParams(
            dimension_semantics=("parallel",),          # shard batch tiles across TCs
        ),
    )(x, w1, b1, w2, b2)


# ----------------------------------------------------------------------------
# _transform_output_to_flat_tuple equivalent (glue, plain Python/JAX)
# ----------------------------------------------------------------------------
def transform_output_to_flat_tuple(data):
    # The torch _OutputIdentityOp exists only to defeat ONNX-exporter graph
    # optimization; on TPU the Identity is either fused into the producing
    # kernel's store (MLP output) or elided (pure passthrough tensors).
    flat = []

    def _flatten(d):
        if d is None:
            return
        elif isinstance(d, jax.Array):
            flat.append(d)
        elif isinstance(d, abc.Sequence) and not isinstance(d, str):
            for v in d:
                _flatten(v)
        elif isinstance(d, abc.Mapping):
            for _, v in sorted(d.items()):
                _flatten(v)
        else:
            raise TypeError(f"Unsupported output type {type(d)}")

    _flatten(data)
    return tuple(flat)


# ----------------------------------------------------------------------------
# The original module (PassthroughNet) and the _FlattenedModule wrapper
# ----------------------------------------------------------------------------
class PassthroughNet:
    def __init__(self, input_size, hidden_size, num_classes, key):
        k1, k2, k3, k4 = jax.random.split(key, 4)
        # Deterministic init; weights stored as (in, out).
        # Weights converted to bf16 once here (not per-forward): halves weight
        # DMA bytes and matches the MXU's peak bf16 path on v6e/v7x.
        self.w1 = (jax.random.normal(k1, (input_size, hidden_size), jnp.float32) * 0.1
                   ).astype(jnp.bfloat16)
        self.b1 = jax.random.normal(k2, (1, hidden_size), jnp.float32) * 0.1
        self.w2 = (jax.random.normal(k3, (hidden_size, num_classes), jnp.float32) * 0.1
                   ).astype(jnp.bfloat16)
        self.b2 = jax.random.normal(k4, (1, num_classes), jnp.float32) * 0.1

    def __call__(self, input1, passthrough_input):
        out1 = mlp_forward(input1, self.w1, self.b1, self.w2, self.b2)
        # use shape from passthrough_input (metadata-only reshape under jit)
        out1 = out1.reshape(passthrough_input.shape[0], -1)
        return out1, passthrough_input


class FlattenedModule:
    """JAX analogue of _FlattenedModule: unflatten args -> run original module
    -> flatten outputs to a flat tuple (Identity fused/elided)."""

    def __init__(self, original_module, num_positionals):
        self._original_module = original_module
        self._num_positionals = num_positionals

    def forward(self, *flat_args):
        # _InputInfo.unflatten: positional args first; kwargs empty here
        # (mirrors the `if not kwargs: ret.append({})` path).
        new_args = flat_args[: self._num_positionals]
        new_kwargs = {}
        return transform_output_to_flat_tuple(
            self._original_module(*new_args, **new_kwargs)
        )


# ----------------------------------------------------------------------------
# Driver
# ----------------------------------------------------------------------------
if __name__ == "__main__":
    key = jax.random.PRNGKey(0)
    k_param, k_x, k_pt = jax.random.split(key, 3)

    # 128-multiple feature dims (lane-dense), batch = 2 tiles of 128 rows so
    # the batch grid axis is actually exercised.
    batch, input_size, hidden_size, num_classes = 256, 128, 256, 128

    net = PassthroughNet(input_size, hidden_size, num_classes, k_param)
    flattened = FlattenedModule(net, num_positionals=2)

    input1 = jax.random.normal(k_x, (batch, input_size), jnp.float32)
    passthrough_input = jax.random.normal(k_pt, (batch, 128), jnp.float32)

    # One jit around the whole flattened forward: single dispatch, reshape is
    # metadata-only, passthrough output needs no copy kernel.
    forward_jit = jax.jit(flattened.forward)
    outputs = forward_jit(input1, passthrough_input)
    outputs = jax.block_until_ready(outputs)

    # Reference check (pure JAX) with matching bf16 MXU inputs / f32 accumulation.
    xb = input1.astype(jnp.bfloat16)
    h = jnp.dot(xb, net.w1, preferred_element_type=jnp.float32) + net.b1
    h = jnp.maximum(h, 0.0).astype(jnp.bfloat16)
    ref = jnp.dot(h, net.w2, preferred_element_type=jnp.float32) + net.b2
    ref = ref.reshape(passthrough_input.shape[0], -1)

    assert len(outputs) == 2
    assert outputs[0].shape == (batch, num_classes)
    assert outputs[1].shape == passthrough_input.shape
    assert jnp.allclose(outputs[0], ref, atol=2e-3, rtol=2e-3)
    assert jnp.allclose(outputs[1], passthrough_input)

    print("KERNEL_OK")
</pallas_src>

<mosaic_0001>
module attributes {stable_mosaic.version = 11 : i64} {
  func.func @_mlp_kernel(%arg0: i32, %arg1: memref<128x128xf32, #tpu.memory_space<vmem>>, %arg2: memref<128x256xbf16, #tpu.memory_space<vmem>>, %arg3: memref<1x256xf32, #tpu.memory_space<vmem>>, %arg4: memref<256x128xbf16, #tpu.memory_space<vmem>>, %arg5: memref<1x128xf32, #tpu.memory_space<vmem>>, %arg6: memref<128x128xf32, #tpu.memory_space<vmem>>) attributes {dimension_semantics = [#tpu.dimension_semantics<parallel>], iteration_bounds = array<i64: 2>, scalar_prefetch = 0 : i64, scratch_operands = 0 : i64, tpu.core_type = #tpu.core_type<tc>, window_params = [{transform_indices = @transform_0, window_bounds = array<i64: 128, 128>}, {pipeline_mode = #tpu.pipeline_mode<synchronous>, transform_indices = @transform_1, window_bounds = array<i64: 128, 256>}, {pipeline_mode = #tpu.pipeline_mode<synchronous>, transform_indices = @transform_2, window_bounds = array<i64: 1, 256>}, {pipeline_mode = #tpu.pipeline_mode<synchronous>, transform_indices = @transform_3, window_bounds = array<i64: 256, 128>}, {pipeline_mode = #tpu.pipeline_mode<synchronous>, transform_indices = @transform_4, window_bounds = array<i64: 1, 128>}, {transform_indices = @transform_5, window_bounds = array<i64: 128, 128>}]} {
    %c0 = arith.constant 0 : index
    %c0_0 = arith.constant 0 : index
    %0 = vector.load %arg1[%c0, %c0_0] : memref<128x128xf32, #tpu.memory_space<vmem>>, vector<128x128xf32>
    %1 = arith.truncf %0 : vector<128x128xf32> to vector<128x128xbf16>
    %c0_1 = arith.constant 0 : index
    %c0_2 = arith.constant 0 : index
    %2 = vector.load %arg2[%c0_1, %c0_2] : memref<128x256xbf16, #tpu.memory_space<vmem>>, vector<128x256xbf16>
    %cst = arith.constant dense<0.000000e+00> : vector<128x256xf32>
    %3 = tpu.matmul %1, %2, %cst {dimension_numbers = #tpu.dot_dimension_numbers<[1], [0], [0], [1], [0, 0, 1, 1], [], []>} : vector<128x128xbf16>, vector<128x256xbf16>, vector<128x256xf32> -> vector<128x256xf32>
    %c0_3 = arith.constant 0 : index
    %c0_4 = arith.constant 0 : index
    %4 = vector.load %arg3[%c0_3, %c0_4] : memref<1x256xf32, #tpu.memory_space<vmem>>, vector<1x256xf32>
    %5 = vector.broadcast %4 : vector<1x256xf32> to vector<128x256xf32>
    %6 = arith.addf %3, %5 : vector<128x256xf32>
    %cst_5 = arith.constant 0.000000e+00 : f32
    %7 = vector.broadcast %cst_5 : f32 to vector<128x256xf32>
    %8 = arith.maximumf %6, %7 : vector<128x256xf32>
    %9 = arith.truncf %8 : vector<128x256xf32> to vector<128x256xbf16>
    %c0_6 = arith.constant 0 : index
    %c0_7 = arith.constant 0 : index
    %10 = vector.load %arg4[%c0_6, %c0_7] : memref<256x128xbf16, #tpu.memory_space<vmem>>, vector<256x128xbf16>
    %cst_8 = arith.constant dense<0.000000e+00> : vector<128x128xf32>
    %11 = tpu.matmul %9, %10, %cst_8 {dimension_numbers = #tpu.dot_dimension_numbers<[1], [0], [0], [1], [0, 0, 1, 1], [], []>} : vector<128x256xbf16>, vector<256x128xbf16>, vector<128x128xf32> -> vector<128x128xf32>
    %c0_9 = arith.constant 0 : index
    %c0_10 = arith.constant 0 : index
    %12 = vector.load %arg5[%c0_9, %c0_10] : memref<1x128xf32, #tpu.memory_space<vmem>>, vector<1x128xf32>
    %13 = vector.broadcast %12 : vector<1x128xf32> to vector<128x128xf32>
    %14 = arith.addf %11, %13 : vector<128x128xf32>
    %c0_11 = arith.constant 0 : index
    %c0_12 = arith.constant 0 : index
    %15 = vector.load %arg6[%c0_11, %c0_12] : memref<128x128xf32, #tpu.memory_space<vmem>>, vector<128x128xf32>
    tpu.vector_store %arg6[%c0_11, %c0_12], %14 {strides = array<i32>} : memref<128x128xf32, #tpu.memory_space<vmem>>, vector<128x128xf32>,
    return
  }
  func.func @transform_0(%arg0: i32) -> (i32, i32) {
    %c0_i32 = arith.constant 0 : i32
    %c0_i32_0 = arith.constant 0 : i32
    return %arg0, %c0_i32 : i32, i32
  }
  func.func @transform_1(%arg0: i32) -> (i32, i32) {
    %c0_i32 = arith.constant 0 : i32
    %c0_i32_0 = arith.constant 0 : i32
    %c0_i32_1 = arith.constant 0 : i32
    return %c0_i32, %c0_i32_0 : i32, i32
  }
  func.func @transform_2(%arg0: i32) -> (i32, i32) {
    %c0_i32 = arith.constant 0 : i32
    %c0_i32_0 = arith.constant 0 : i32
    %c0_i32_1 = arith.constant 0 : i32
    return %c0_i32, %c0_i32_0 : i32, i32
  }
  func.func @transform_3(%arg0: i32) -> (i32, i32) {
    %c0_i32 = arith.constant 0 : i32
    %c0_i32_0 = arith.constant 0 : i32
    %c0_i32_1 = arith.constant 0 : i32
    return %c0_i32, %c0_i32_0 : i32, i32
  }
  func.func @transform_4(%arg0: i32) -> (i32, i32) {
    %c0_i32 = arith.constant 0 : i32
    %c0_i32_0 = arith.constant 0 : i32
    %c0_i32_1 = arith.constant 0 : i32
    return %c0_i32, %c0_i32_0 : i32, i32
  }
  func.func @transform_5(%arg0: i32) -> (i32, i32) {
    %c0_i32 = arith.constant 0 : i32
    %c0_i32_0 = arith.constant 0 : i32
    return %arg0, %c0_i32 : i32, i32
  }
}

</mosaic_0001>

<bundles_post_ra>
// kernel: forward.1
= control target key start
LH: loop header
LB: loop body
LE: loop exit
PB: predicated region body
PF: predicated region fallthrough
CT: control target
= control target key end

     0   :  { %10 = vsyncpa [#allocation3], 0  ;;  %s1647_s0 = inlined_call_operand.hbm [shape: f32[256,128], index: 0, kind: input, shape index: {}]   ;;  %s1648_s1 = inlined_call_operand.hbm [shape: bf16[128,256], index: 1, kind: input, shape index: {}]   ;;  %s1649_s2 = inlined_call_operand.vmem [shape: f32[1,256], index: 2, kind: input, shape index: {}]   ;;  %s1650_s3 = inlined_call_operand.hbm [shape: bf16[256,128], index: 3, kind: input, shape index: {}]   ;;  %s1651_s4 = inlined_call_operand.vmem [shape: f32[1,128], index: 4, kind: input, shape index: {}]   ;;  %s1652_s5 = inlined_call_operand.hbm [shape: f32[256,128], index: 5, kind: output, shape index: {}]  }
   0x1   :  { %12 = vsyncpa [#allocation3 + $0x1], 0 }
   0x2   :  { %13 = vsyncpa [#allocation6], 0 }
   0x3   :  { %14 = vsyncpa [#allocation4], 0 }
   0x4   :  { %16 = vsyncpa [#allocation4 + $0x1], 0  ;;  %s1344_s18 = smov 0   ;;  %s1346_s19 = smov 0  }
   0x5   :  { %s1348_s20 = smov 0   ;;  %s1350_s21 = smov 0  }
   0x6 LB: > { %s1365_s22 = sadd.s32 4294967295, %s1301_s21   ;;  %s922_s23 = sadd.s32 4294967294, %s1301_s21   ;;  %s1301_s21 = sphi %s1350_s21, %s1675_s21   ;;  %s1297_s20 = sphi %s1348_s20, %s1674_s20   ;;  %s1293_s19 = sphi %s1346_s19, %s1673_s19   ;;  %s1289_s18 = sphi %s1344_s18, %s1672_s18  }
   0x7   : > { %p42_p0 = scmp.ne.s32.totalorder %s1293_s19, %s1289_s18  ;;  %p1653_p1 = scmp.eq.s32.totalorder %s1365_s22, 0 }
   0x8   : > { %p150_p2 = scmp.eq.s32.totalorder %s1365_s22, 1  ;;  %p156_p3 = scmp.eq.s32.totalorder %s922_s23, 1 }
   0x9   : > { %p1374_p4 = por %p1653_p1, %p42_p0  ;;  %p923_p5 = scmp.ge.s32.totalorder %s1301_s21, 1 }
   0xa   : > { %p1379_p6 = por %p156_p3, %p42_p0  ;;  %p163_p7 = scmp.lt.s32.totalorder %s1301_s21, 3 }
   0xb   : > { %s1658_s24 = scalar_select %p1374_p4, 1, 0 }
   0xc   : > { %s1659_s25 = scalar_select %p1379_p6, 1, 0 }
   0xd   : > { %p1384_p8 = pnand %p923_p5, %p163_p7  ;;  %s1303_s27 = smov [#allocation5]  }
   0xe   : > { %s175_s28 = sshll.u32 %s1303_s27, 4  ;;  %s1304_s30 = smov [#allocation7]   ;;  %s176_s28 = int_to_ptr.vmem [resolvable:$true] %s175_s28 }
   0xf   : > { %s1660_s26 = scalar_select %p1384_p8, 1, 0 }
  0x10   : > { %p1051_p9 = pneg %p1384_p8  ;;  %s191_s6 = sshll.u32 %s1304_s30, 4  ;;  %s192_s6 = int_to_ptr.vmem [resolvable:$true] %s191_s6 }
  0x11   : > { %s1164_s7 = scalar_lea.vmem %s176_s28, 2048  ;;  %p1172_p5 = scmp.lt.s32.totalorder %s176_s28, %s176_s28 }
  0x12   : > { %p1393_p11 = pnand %p1051_p9, %p1653_p1  ;;  %p1165_p13 = scmp.ne.s32.totalorder %s176_s28, %s1164_s7 }
  0x13   : > { %p1173_p7 = scmp.lt.s32.totalorder %s1164_s7, %s1164_s7 }
  0x14   : > { %p1155_p12 = pneg %p1393_p11 }
  0x15   : > { %p1174_p10 = por %p1173_p7, %p1172_p5 }
  0x16   : > { %p1167_p0 = pnand %p1165_p13, %p1155_p12 }
  0x18   : > { %p1168_p3 = pneg %p1167_p0 }
  0x1a   : > { %p1175_p9 = pnand %p1174_p10, %p1168_p3 }
  0x1c   : > { %1178 = shalt.err (!%p1175_p9)
}
  0x1d   : > { %s1654_s8 = smov 128   ;;  %s1306_s9 = smov 8  }
  0x1e   : > { %1054 = dma.hbm_to_vmem [thread:$0]  (!%p1393_p11), %s1648_s1, 2048, %s176_s28, [#allocation6], %s1654_s8, %s1654_s8, %s1306_s9  }
  0x1f   : > { %s1190_s12 = scalar_lea.vmem %s192_s6, 2048  ;;  %p1198_p10 = scmp.lt.s32.totalorder %s192_s6, %s192_s6 }
  0x20   : > { %p1191_p13 = scmp.ne.s32.totalorder %s192_s6, %s1190_s12  ;;  %p1199_p3 = scmp.lt.s32.totalorder %s1190_s12, %s1190_s12 }
  0x22   : > { %p1193_p0 = pnand %p1191_p13, %p1155_p12  ;;  %p1200_p7 = por %p1199_p3, %p1198_p10 }
  0x24   : > { %p1194_p5 = pneg %p1193_p0 }
  0x26   : > { %p1201_p9 = pnand %p1200_p7, %p1194_p5 }
  0x28   : > { %1204 = shalt.err (!%p1201_p9)
}
  0x29   : > { %s1307_s13 = smov 64   ;;  %s1308_s14 = smov 4  }
  0x2a   : > { %1057 = dma.hbm_to_vmem [thread:$0]  (!%p1393_p11), %s1650_s3, 2048, %s192_s6, [#allocation6], %s1307_s13, %s1307_s13, %s1308_s14  }
  0x2b   : > { %s1419_s17 = sadd.s32 1, %s1301_s21   ;;  %s29_s27 = sadd.s32 1, %s1297_s20 }
  0x2c   : > { %s26_s23 = ssub.s32 %s1301_s21, %s1419_s17  ;;  %p36_p13 = scmp.ne.s32.totalorder %s1297_s20, %s1293_s19 }
  0x2d   : > { %p27_p12 = scmp.eq.s32.totalorder %s26_s23, 0  ;;  %p37_p0 = scmp.eq.s32.totalorder %s1301_s21, 0 }
  0x2e   : > { %p1432_p10 = por %p150_p2, %p36_p13  ;;  %p1068_p3 = scmp.lt.s32.totalorder %s1301_s21, 2 }
  0x2f   : > { %s1428_s28 = scalar_select %p27_p12, %s1297_s20, %s29_s27  }
  0x30   : > { %p38_p5 = por %p37_p0, %p36_p13  ;;  %s208_s29 = sand.u32 1, %s1297_s20  }
  0x31   : > { %s1662_s30 = scalar_select %p1432_p10, 1, 0 }
  0x32   : > { %s927_s7 = sshll.u32 %s208_s29, 7  ;;  %s973_s6 = sshll.u32 %s1301_s21, 11 }
  0x33   : > { %s1442_s12 = scalar_lea.hbm %s1647_s0, %s973_s6  ;;  %s212_s13 = scalar_lea.vmem [#allocation2], %s927_s7 }
  0x34   : > { %s219_s14 = sshll.u32 %s212_s13, 4  ;;  %p1446_p2 = pnand %p1068_p3, %p38_p5  ;;  %s1444_s14 = int_to_ptr.vmem [resolvable:$true] %s219_s14 }
  0x35   : > { %s1450_s16 = scalar_lea.sflag [#allocation3], %s208_s29  ;;  %s1205_s23 = scalar_lea.hbm %s1442_s12, 2048 }
  0x36   : > { %p1206_p11 = scmp.ne.s32.totalorder %s1442_s12, %s1205_s23  ;;  %p1207_p7 = pneg %p1446_p2 }
  0x37   : > { %s1210_s7 = scalar_lea.hbm %s1647_s0, 4096  ;;  %p1211_p13 = scmp.lt.s32.totalorder %s1442_s12, %s1647_s0 }
  0x38   : > { %p1208_p9 = pnand %p1207_p7, %p1206_p11  ;;  %p1212_p0 = scmp.lt.s32.totalorder %s1210_s7, %s1205_s23 }
  0x3a   : > { %p1209_p12 = pneg %p1208_p9  ;;  %p1213_p5 = por %p1212_p0, %p1211_p13 }
  0x3c   : > { %p1214_p3 = pnand %p1213_p5, %p1209_p12 }
  0x3e   : > { %1217 = shalt.err (!%p1214_p3)
}
  0x3f   : > { %s1218_s29 = scalar_lea.vmem %s1444_s14, 2048  ;;  %s1309_s13 = smov [#allocation2]  }
  0x40   : > { %p1219_p1 = scmp.ne.s32.totalorder %s1444_s14, %s1218_s29  ;;  %s1223_s8 = sshll.u32 %s1309_s13, 4  ;;  %s1224_s8 = int_to_ptr.vmem [resolvable:$false] %s1223_s8 }
  0x41   : > { %s1225_s27 = scalar_lea.vmem %s1224_s8, 4096  ;;  %p1226_p9 = scmp.lt.s32.totalorder %s1444_s14, %s1224_s8 }
  0x42   : > { %p1221_p6 = pnand %p1219_p1, %p1207_p7  ;;  %p1227_p10 = scmp.lt.s32.totalorder %s1225_s27, %s1218_s29 }
  0x44   : > { %p1222_p11 = pneg %p1221_p6  ;;  %p1228_p4 = por %p1227_p10, %p1226_p9 }
  0x46   : > { %p1229_p8 = pnand %p1228_p4, %p1222_p11 }
  0x48   : > { %1232 = shalt.err (!%p1229_p8)
}
  0x49   : > { %s1664_s23 = smov 128   ;;  %p1665_p1 = scmp.ne.s32.totalorder %s1660_s26, 0 }
  0x4a   : > { %1061 = dma.hbm_to_vmem [thread:$0]  (!%p1446_p2), %s1442_s12, 2048, %s1444_s14, %s1450_s16, %s1664_s23, %s1664_s23, %s1306_s9  }
  0x4b   : > { %231 = sbr.rel (%p1665_p1) target bundleno = 596 (0x254), region = 40  ;;  %s1477_s6 = sand.u32 (!%p1665_p1), 1, %s1293_s19  }
  0x4c   : > { %s931_s8 = sshll.u32 (!%p1665_p1), %s1477_s6, 7  ;;  %s234_s7 = scalar_lea.sflag (!%p1665_p1), [#allocation3], %s1477_s6 }
  0x4d   : > { %s1483_s15 = scalar_lea.vmem (!%p1665_p1), [#allocation2], %s931_s8  ;;  %p1666_p4 = scmp.ne.s32.totalorder (!%p1665_p1), %s1658_s24, 0 }
  0x50   : > { %1276 = dma.done.wait (%p1666_p4), %s234_s7, 2048  }
  0x51   : > { %1278 = vsyncadd (%p1666_p4), %s234_s7, 4294965248  ;;  %p1667_p6 = scmp.eq.s32.totalorder %s1365_s22, 0 }
  0x53   : > { %1280 = dma.done.wait (%p1667_p6), [#allocation6], 4096   ;;  %p1668_p8 = pmov %p1667_p6 }
  0x54   : > { %v1310_v0 = vmov 0   ;;  %v1113_v1 = vld [vmem:[#allocation5 + $0x74] ss:$8 sps:$4 sm:$0xff]   ;;  %v1115_v2 = vld [vmem:[#allocation5 + $0x70] ss:$8 sps:$4 sm:$0xff]   ;;  %v1141_v18 = vld [vmem:[#allocation7 + $0x68] sm:$0xff]   ;;  %v317_v57 = vlaneseq }
  0x55   : > { %1282 = vsyncadd (%p1668_p8), [#allocation6], 4294963200  ;;  %439 = vmatprep.mubr.bf16.mxu0 %v1310_v0  ;;  %407 = vmatprep.subr.bf16.mxu0 %v1113_v1  ;;  %v1116_v3 = vld [vmem:[#allocation5 + $0x64] ss:$8 sps:$4 sm:$0xff]   ;;  %v1118_v4 = vld [vmem:[#allocation5 + $0x60] ss:$8 sps:$4 sm:$0xff]  }
  0x56   : > { %408 = vmatpush1.bf16.msra.mxu0 %v1115_v2  ;;  %v1119_v5 = vld [vmem:[#allocation5 + $0x54] ss:$8 sps:$4 sm:$0xff]   ;;  %v1121_v6 = vld [vmem:[#allocation5 + $0x50] ss:$8 sps:$4 sm:$0xff]   ;;  %v1122_v7 = vld [vmem:[#allocation5 + $0x44] ss:$8 sps:$4 sm:$0xff]  }
  0x57   : > { %409 = vmatprep.subr.bf16.mxu0 %v1116_v3  ;;  %v1124_v8 = vld [vmem:[#allocation5 + $0x40] ss:$8 sps:$4 sm:$0xff]   ;;  %v1125_v9 = vld [vmem:[#allocation5 + $0x34] ss:$8 sps:$4 sm:$0xff]   ;;  %v1127_v10 = vld [vmem:[#allocation5 + $0x30] ss:$8 sps:$4 sm:$0xff]  }
  0x58   : > { %v1128_v11 = vld [vmem:[#allocation5 + $0x24] ss:$8 sps:$4 sm:$0xff]   ;;  %v1137_v12 = vld [vmem:[#allocation7 + $0x78] sm:$0xff]   ;;  %v1130_v13 = vld [vmem:[#allocation5 + $0x20] ss:$8 sps:$4 sm:$0xff]   ;;  %v318_v58 = vshrl.u32 %v317_v57, 7 }
  0x59   : > { %v1138_v14 = vld [vmem:[#allocation7 + $0x38] sm:$0xff]   ;;  %975 = vmatprep.subr.bf16.mxu1 %v1137_v12  ;;  %v1139_v16 = vld [vmem:[#allocation7 + $0x70] sm:$0xff]   ;;  %v1134_v20 = vld [vmem:[#allocation5 + $0x4] ss:$8 sps:$4 sm:$0xff]   ;;  %s1564_s14 = scalar_lea.vmem [#allocation8], %s931_s8  ;;  %s974_s16 = sshll.u32 %s1365_s22, 11 }
  0x5a   : > { %410 = vmatpush1.bf16.msra.mxu0 %v1118_v4  ;;  %v1131_v15 = vld [vmem:[#allocation5 + $0x14] ss:$8 sps:$4 sm:$0xff]   ;;  %976 = vmatpush3.bf16.msra.mxu1 %v1138_v14  ;;  %v1133_v19 = vld [vmem:[#allocation5 + $0x10] ss:$8 sps:$4 sm:$0xff]   ;;  %v1142_v21 = vld [vmem:[#allocation7 + $0x28] sm:$0xff]   ;;  %v323_v59 = vsub.s32 1, %v318_v58  ;;  %s1600_s13 = scalar_lea.hbm %s1652_s5, %s974_s16 }
  0x5b   : > { %411 = vmatprep.subr.bf16.mxu0 %v1119_v5  ;;  %v1140_v17 = vld [vmem:[#allocation7 + $0x30] sm:$0xff]   ;;  %977 = vmatprep.subr.bf16.mxu1 %v1139_v16  ;;  %v1143_v22 = vld [vmem:[#allocation7 + $0x60] sm:$0xff]   ;;  %v276_v25 = vld [vmem:[%s1483_s15 + $0x8] sm:$0xff]  ;;  %v319_v60 = vsub.s32 0, %v318_v58  ;;  %s830_s10 = sshll.u32 %s1564_s14, 4  ;;  %s817_s27 = scalar_lea.sflag [#allocation4], %s1477_s6  ;;  %s1602_s10 = int_to_ptr.vmem [resolvable:$true] %s830_s10 }
  0x5c   : > { %v1136_v23 = vld [vmem:[#allocation5] ss:$8 sps:$4 sm:$0xff]   ;;  %v1145_v27 = vld [vmem:[#allocation7 + $0x58] sm:$0xff]   ;;  %v277_v30 = vld [vmem:[%s1483_s15 + $0x10] sm:$0xff]  ;;  %s1233_s23 = scalar_lea.vmem %s1602_s10, 2048  ;;  %p1669_p2 = scmp.ne.s32.totalorder %s1662_s30, 0 }
  0x5d   : > { %v275_v24 = vld [vmem:[%s1483_s15] sm:$0xff]  ;;  %v1146_v29 = vld [vmem:[#allocation7 + $0x18] sm:$0xff]   ;;  %v280_v34 = vld [vmem:[%s1483_s15 + $0x28] sm:$0xff]  ;;  %p1234_p10 = scmp.ne.s32.totalorder %s1602_s10, %s1233_s23  ;;  %s1311_s22 = smov [#allocation8]  }
  0x5e   : > { %412 = vmatpush1.bf16.msra.mxu0 %v1121_v6  ;;  %978 = vmatpush3.bf16.msra.mxu1 %v1140_v17  ;;  %v1144_v26 = vld [vmem:[#allocation7 + $0x20] sm:$0xff]   ;;  %v291_v28 = vpack.c.bf16 %v276_v25, %v275_v24  ;;  %v278_v31 = vld [vmem:[%s1483_s15 + $0x18] sm:$0xff]  ;;  %v281_v36 = vld [vmem:[%s1483_s15 + $0x30] sm:$0xff]  ;;  %s1237_s8 = sshll.u32 %s1311_s22, 4  ;;  %s1238_s8 = int_to_ptr.vmem [resolvable:$false] %s1237_s8 }
  0x5f   : > { %413 = vmatprep.subr.bf16.mxu0 %v1122_v7  ;;  %979 = vmatprep.subr.bf16.mxu1 %v1141_v18  ;;  %v292_v32 = vpack.c.bf16 %v278_v31, %v277_v30  ;;  %v279_v33 = vld [vmem:[%s1483_s15 + $0x20] sm:$0xff]  ;;  %v282_v37 = vld [vmem:[%s1483_s15 + $0x38] sm:$0xff]  ;;  %v284_v40 = vld [vmem:[%s1483_s15 + $0x48] sm:$0xff]  ;;  %p1235_p7 = pnand %p1234_p10, %p1669_p2  ;;  %s1239_s7 = scalar_lea.vmem %s1238_s8, 4096 }
  0x60   : > { %v293_v35 = vpack.c.bf16 %v280_v34, %v279_v33  ;;  %v294_v38 = vpack.c.bf16 %v282_v37, %v281_v36  ;;  %v283_v39 = vld [vmem:[%s1483_s15 + $0x40] sm:$0xff]  ;;  %v285_v42 = vld [vmem:[%s1483_s15 + $0x50] sm:$0xff]  ;;  %v286_v43 = vld [vmem:[%s1483_s15 + $0x58] sm:$0xff]  ;;  %p1240_p13 = scmp.lt.s32.totalorder %s1602_s10, %s1238_s8  ;;  %p1241_p0 = scmp.lt.s32.totalorder %s1239_s7, %s1233_s23 }
  0x61   : > { %v295_v41 = vpack.c.bf16 %v284_v40, %v283_v39  ;;  %v296_v44 = vpack.c.bf16 %v286_v43, %v285_v42  ;;  %v287_v45 = vld [vmem:[%s1483_s15 + $0x60] sm:$0xff]  ;;  %v288_v46 = vld [vmem:[%s1483_s15 + $0x68] sm:$0xff]  ;;  %v289_v48 = vld [vmem:[%s1483_s15 + $0x70] sm:$0xff]  ;;  %p1236_p12 = pneg %p1235_p7 }
  0x62   : > { %414 = vmatpush1.bf16.msra.mxu0 %v1124_v8  ;;  %980 = vmatpush3.bf16.msra.mxu1 %v1142_v21  ;;  %v297_v47 = vpack.c.bf16 %v288_v46, %v287_v45  ;;  %v290_v49 = vld [vmem:[%s1483_s15 + $0x78] sm:$0xff]  ;;  %v1147_v51 = vld [vmem:[#allocation7 + $0x50] sm:$0xff]   ;;  %v1149_v53 = vld [vmem:[#allocation7 + $0x48] sm:$0xff]   ;;  %p1242_p5 = por %p1241_p0, %p1240_p13 }
  0x63   : > { %415 = vmatprep.subr.bf16.mxu0 %v1125_v9  ;;  %981 = vmatprep.subr.bf16.mxu1 %v1143_v22  ;;  %v298_v50 = vpack.c.bf16 %v290_v49, %v289_v48  ;;  %v1148_v52 = vld [vmem:[#allocation7 + $0x10] sm:$0xff]   ;;  %v1150_v54 = vld [vmem:[#allocation7 + $0x8] sm:$0xff]   ;;  %v1151_v55 = vld [vmem:[#allocation7 + $0x40] sm:$0xff]  }
  0x64   : > { %v1152_v56 = vld [vmem:[#allocation7] sm:$0xff]   ;;  %p1243_p3 = pnand %p1242_p5, %p1236_p12 }
  0x65   : > { %v315_v61 = vld [vmem:[%s1649_s2] sm:$0x3] }
  0x66   : > { %416 = vmatpush1.bf16.msra.mxu0 %v1127_v10  ;;  %982 = vmatpush3.bf16.msra.mxu1 %v1144_v26  ;;  %v1520_v63 = vrot.slane %v315_v61, %v323_v59 }
  0x67   : > { %417 = vmatprep.subr.bf16.mxu0 %v1128_v11  ;;  %983 = vmatprep.subr.bf16.mxu1 %v1145_v27 }
  0x6a   : > { %418 = vmatpush1.bf16.msra.mxu0 %v1130_v13  ;;  %984 = vmatpush3.bf16.msra.mxu1 %v1146_v29 }
  0x6b   : > { %419 = vmatprep.subr.bf16.mxu0 %v1131_v15  ;;  %985 = vmatprep.subr.bf16.mxu1 %v1147_v51 }
  0x6e   : > { %420 = vmatpush1.bf16.msra.mxu0 %v1133_v19  ;;  %986 = vmatpush3.bf16.msra.mxu1 %v1148_v52 }
  0x6f   : > { %421 = vmatprep.subr.bf16.mxu0 %v1134_v20  ;;  %987 = vmatprep.subr.bf16.mxu1 %v1149_v53 }
  0x72   : > { %422 = vmatpush1.bf16.msra.mxu0 %v1136_v23  ;;  %988 = vmatpush3.bf16.msra.mxu1 %v1150_v54 }
  0x73   : > { %989 = vmatprep.subr.bf16.mxu1 %v1151_v55 }
  0x75   : > { %440 = vmatmul.mubr.bf16.vlgmr.msra.gmra.mxu0 %v291_v28 }
  0x76   : > { %449 = vmatprep.mubr.bf16.mxu0 %v1310_v0  ;;  %990 = vmatpush3.bf16.msra.mxu1 %v1152_v56 }
  0x7d   : > { %450 = vmatmul.mubr.bf16.gmra.mxu0 %v292_v32 }
  0x7e   : > { %459 = vmatprep.mubr.bf16.mxu0 %v1310_v0 }
  0x85   : > { %460 = vmatmul.mubr.bf16.gmra.mxu0 %v293_v35 }
  0x86   : > { %469 = vmatprep.mubr.bf16.mxu0 %v1310_v0 }
  0x8d   : > { %470 = vmatmul.mubr.bf16.gmra.mxu0 %v294_v38 }
  0x8e   : > { %479 = vmatprep.mubr.bf16.mxu0 %v1310_v0 }
  0x95   : > { %480 = vmatmul.mubr.bf16.gmra.mxu0 %v295_v41 }
  0x96   : > { %489 = vmatprep.mubr.bf16.mxu0 %v1310_v0 }
  0x9d   : > { %490 = vmatmul.mubr.bf16.gmra.mxu0 %v296_v44 }
  0x9e   : > { %499 = vmatprep.mubr.bf16.mxu0 %v1310_v0 }
  0xa5   : > { %500 = vmatmul.mubr.bf16.gmra.mxu0 %v297_v47 }
  0xa6   : > { %509 = vmatprep.mubr.bf16.mxu0 %v1310_v0  ;;  %v1522_v0 = vrot.slane %v315_v61, %v319_v60 }
  0xad   : > { %510 = vmatmul.mubr.bf16.gmra.mxu0 %v298_v50 }
 0x135   : > { %v441_v62 = vpop.f32.mrf.mxu0 }
 0x136   : > { %v442_v5 = vadd.f32 %v441_v62, %v1522_v0 }
 0x137   : > { %v443_v1 = vpop.f32.mrf.mxu0 }
 0x138   : > { %v444_v3 = vadd.f32 %v443_v1, %v1520_v63  ;;  %v520_v12 = vmax.f32 %v442_v5, 0.0 }
 0x139   : > { %v445_v2 = vpop.f32.mrf.mxu0 }
 0x13a   : > { %v446_v4 = vadd.f32 %v445_v2, %v1522_v0  ;;  %v521_v10 = vmax.f32 %v444_v3, 0.0 }
 0x13b   : > { %v447_v6 = vpop.f32.mrf.mxu0 }
 0x13c   : > { %v448_v7 = vadd.f32 %v447_v6, %v1520_v63  ;;  %v522_v8 = vmax.f32 %v446_v4, 0.0 }
 0x13d   : > { %v451_v9 = vpop.f32.mrf.mxu0 }
 0x13e   : > { %v523_v11 = vmax.f32 %v448_v7, 0.0  ;;  %v552_v15 = vpack.c.bf16 %v522_v8, %v520_v12  ;;  %v452_v19 = vadd.f32 %v451_v9, %v1522_v0 }
 0x13f   : > { %v453_v13 = vpop.f32.mrf.mxu0 }
 0x140   : > { %v553_v14 = vpack.c.bf16 %v523_v11, %v521_v10  ;;  %v454_v17 = vadd.f32 %v453_v13, %v1520_v63  ;;  %v524_v26 = vmax.f32 %v452_v19, 0.0 }
 0x141   : > { %v455_v16 = vpop.f32.mrf.mxu0 }
 0x142   : > { %v456_v18 = vadd.f32 %v455_v16, %v1522_v0  ;;  %735 = vmatprep.mubr.bf16.mxu1 %v553_v14  ;;  %v525_v24 = vmax.f32 %v454_v17, 0.0 }
 0x143   : > { %v457_v20 = vpop.f32.mrf.mxu0  ;;  %736 = vmatmul.mubr.bf16.vlgmr.msra.gmra.mxu1 %v552_v15 }
 0x144   : > { %v458_v21 = vadd.f32 %v457_v20, %v1520_v63  ;;  %v526_v22 = vmax.f32 %v456_v18, 0.0 }
 0x145   : > { %v461_v23 = vpop.f32.mrf.mxu0 }
 0x146   : > { %v527_v25 = vmax.f32 %v458_v21, 0.0  ;;  %v554_v29 = vpack.c.bf16 %v526_v22, %v524_v26  ;;  %v462_v33 = vadd.f32 %v461_v23, %v1522_v0 }
 0x147   : > { %v463_v27 = vpop.f32.mrf.mxu0 }
 0x148   : > { %v555_v28 = vpack.c.bf16 %v527_v25, %v525_v24  ;;  %v464_v31 = vadd.f32 %v463_v27, %v1520_v63  ;;  %v528_v40 = vmax.f32 %v462_v33, 0.0 }
 0x149   : > { %v465_v30 = vpop.f32.mrf.mxu0 }
 0x14a   : > { %v466_v32 = vadd.f32 %v465_v30, %v1522_v0  ;;  %743 = vmatprep.mubr.bf16.mxu1 %v555_v28  ;;  %v529_v38 = vmax.f32 %v464_v31, 0.0 }
 0x14b   : > { %v467_v34 = vpop.f32.mrf.mxu0  ;;  %744 = vmatmul.mubr.bf16.gmra.mxu1 %v554_v29 }
 0x14c   : > { %v468_v35 = vadd.f32 %v467_v34, %v1520_v63  ;;  %v530_v36 = vmax.f32 %v466_v32, 0.0 }
 0x14d   : > { %v471_v37 = vpop.f32.mrf.mxu0 }
 0x14e   : > { %v531_v39 = vmax.f32 %v468_v35, 0.0  ;;  %v556_v43 = vpack.c.bf16 %v530_v36, %v528_v40  ;;  %v472_v47 = vadd.f32 %v471_v37, %v1522_v0 }
 0x14f   : > { %v473_v41 = vpop.f32.mrf.mxu0 }
 0x150   : > { %v557_v42 = vpack.c.bf16 %v531_v39, %v529_v38  ;;  %v474_v45 = vadd.f32 %v473_v41, %v1520_v63  ;;  %v532_v54 = vmax.f32 %v472_v47, 0.0 }
 0x151   : > { %v475_v44 = vpop.f32.mrf.mxu0 }
 0x152   : > { %v476_v46 = vadd.f32 %v475_v44, %v1522_v0  ;;  %751 = vmatprep.mubr.bf16.mxu1 %v557_v42  ;;  %v533_v52 = vmax.f32 %v474_v45, 0.0 }
 0x153   : > { %v477_v48 = vpop.f32.mrf.mxu0  ;;  %752 = vmatmul.mubr.bf16.gmra.mxu1 %v556_v43 }
 0x154   : > { %v478_v49 = vadd.f32 %v477_v48, %v1520_v63  ;;  %v534_v50 = vmax.f32 %v476_v46, 0.0 }
 0x155   : > { %v481_v51 = vpop.f32.mrf.mxu0 }
 0x156   : > { %v535_v53 = vmax.f32 %v478_v49, 0.0  ;;  %v558_v57 = vpack.c.bf16 %v534_v50, %v532_v54  ;;  %v482_v61 = vadd.f32 %v481_v51, %v1522_v0  ;;  %v1559_v51 = vld [vmem:[%s1651_s4] ss:$0 sm:$0xff] }
 0x157   : > { %v483_v55 = vpop.f32.mrf.mxu0 }
 0x158   : > { %v559_v56 = vpack.c.bf16 %v535_v53, %v533_v52  ;;  %v484_v59 = vadd.f32 %v483_v55, %v1520_v63  ;;  %v536_v6 = vmax.f32 %v482_v61, 0.0 }
 0x159   : > { %v485_v58 = vpop.f32.mrf.mxu0 }
 0x15a   : > { %v486_v60 = vadd.f32 %v485_v58, %v1522_v0  ;;  %759 = vmatprep.mubr.bf16.mxu1 %v559_v56  ;;  %v537_v4 = vmax.f32 %v484_v59, 0.0 }
 0x15b   : > { %v487_v62 = vpop.f32.mrf.mxu0  ;;  %760 = vmatmul.mubr.bf16.gmra.mxu1 %v558_v57 }
 0x15c   : > { %v488_v1 = vadd.f32 %v487_v62, %v1520_v63  ;;  %v538_v2 = vmax.f32 %v486_v60, 0.0 }
 0x15d   : > { %v491_v3 = vpop.f32.mrf.mxu0 }
 0x15e   : > { %v539_v5 = vmax.f32 %v488_v1, 0.0  ;;  %v560_v9 = vpack.c.bf16 %v538_v2, %v536_v6  ;;  %v492_v13 = vadd.f32 %v491_v3, %v1522_v0 }
 0x15f   : > { %v493_v7 = vpop.f32.mrf.mxu0 }
 0x160   : > { %v561_v8 = vpack.c.bf16 %v539_v5, %v537_v4  ;;  %v494_v11 = vadd.f32 %v493_v7, %v1520_v63  ;;  %v540_v20 = vmax.f32 %v492_v13, 0.0 }
 0x161   : > { %v495_v10 = vpop.f32.mrf.mxu0 }
 0x162   : > { %v496_v12 = vadd.f32 %v495_v10, %v1522_v0  ;;  %767 = vmatprep.mubr.bf16.mxu1 %v561_v8  ;;  %v541_v18 = vmax.f32 %v494_v11, 0.0 }
 0x163   : > { %v497_v14 = vpop.f32.mrf.mxu0  ;;  %768 = vmatmul.mubr.bf16.gmra.mxu1 %v560_v9 }
 0x164   : > { %v498_v15 = vadd.f32 %v497_v14, %v1520_v63  ;;  %v542_v16 = vmax.f32 %v496_v12, 0.0 }
 0x165   : > { %v501_v17 = vpop.f32.mrf.mxu0 }
 0x166   : > { %v543_v19 = vmax.f32 %v498_v15, 0.0  ;;  %v562_v23 = vpack.c.bf16 %v542_v16, %v540_v20  ;;  %v502_v27 = vadd.f32 %v501_v17, %v1522_v0 }
 0x167   : > { %v503_v21 = vpop.f32.mrf.mxu0 }
 0x168   : > { %v563_v22 = vpack.c.bf16 %v543_v19, %v541_v18  ;;  %v504_v25 = vadd.f32 %v503_v21, %v1520_v63  ;;  %v544_v34 = vmax.f32 %v502_v27, 0.0 }
 0x169   : > { %v505_v24 = vpop.f32.mrf.mxu0 }
 0x16a   : > { %v506_v26 = vadd.f32 %v505_v24, %v1522_v0  ;;  %775 = vmatprep.mubr.bf16.mxu1 %v563_v22  ;;  %v545_v32 = vmax.f32 %v504_v25, 0.0 }
 0x16b   : > { %v507_v28 = vpop.f32.mrf.mxu0  ;;  %776 = vmatmul.mubr.bf16.gmra.mxu1 %v562_v23 }
 0x16c   : > { %v508_v29 = vadd.f32 %v507_v28, %v1520_v63  ;;  %v546_v30 = vmax.f32 %v506_v26, 0.0 }
 0x16d   : > { %v511_v31 = vpop.f32.mrf.mxu0 }
 0x16e   : > { %v547_v33 = vmax.f32 %v508_v29, 0.0  ;;  %v564_v37 = vpack.c.bf16 %v546_v30, %v544_v34  ;;  %v512_v41 = vadd.f32 %v511_v31, %v1522_v0 }
 0x16f   : > { %v513_v35 = vpop.f32.mrf.mxu0 }
 0x170   : > { %v565_v36 = vpack.c.bf16 %v547_v33, %v545_v32  ;;  %v514_v39 = vadd.f32 %v513_v35, %v1520_v63  ;;  %v548_v47 = vmax.f32 %v512_v41, 0.0 }
 0x171   : > { %v515_v38 = vpop.f32.mrf.mxu0 }
 0x172   : > { %v516_v40 = vadd.f32 %v515_v38, %v1522_v0  ;;  %783 = vmatprep.mubr.bf16.mxu1 %v565_v36  ;;  %v549_v45 = vmax.f32 %v514_v39, 0.0 }
 0x173   : > { %v517_v42 = vpop.f32.mrf.mxu0  ;;  %784 = vmatmul.mubr.bf16.gmra.mxu1 %v564_v37 }
 0x174   : > { %v518_v43 = vadd.f32 %v517_v42, %v1520_v63  ;;  %v550_v44 = vmax.f32 %v516_v40, 0.0 }
 0x176   : > { %v551_v46 = vmax.f32 %v518_v43, 0.0  ;;  %v566_v49 = vpack.c.bf16 %v550_v44, %v548_v47 }
 0x178   : > { %v567_v48 = vpack.c.bf16 %v551_v46, %v549_v45 }
 0x17a   : > { %791 = vmatprep.mubr.bf16.mxu1 %v567_v48 }
 0x17b   : > { %792 = vmatmul.mubr.bf16.gmra.mxu1 %v566_v49 }
 0x203   : > { %v991_v50 = vpop.f32.mrf.mxu1 }
 0x205   : > { %v992_v0 = vpop.f32.mrf.mxu1 }
 0x206   : > { %v993_v52 = vadd.f32 %v992_v0, %v991_v50 }
 0x207   : > { %v994_v53 = vpop.f32.mrf.mxu1 }
 0x208   : > { %v738_v63 = vadd.f32 %v993_v52, %v1559_v51 }
 0x209   : > { %v995_v54 = vpop.f32.mrf.mxu1 }
 0x20a   : > { %800 = vst [vmem:[%s1564_s14] sm:$0xff] %v738_v63  ;;  %v996_v55 = vadd.f32 %v995_v54, %v994_v53 }
 0x20b   : > { %v997_v56 = vpop.f32.mrf.mxu1 }
 0x20c   : > { %v741_v57 = vadd.f32 %v996_v55, %v1559_v51 }
 0x20d   : > { %v998_v58 = vpop.f32.mrf.mxu1 }
 0x20e   : > { %801 = vst [vmem:[%s1564_s14 + $0x8] sm:$0xff] %v741_v57  ;;  %v999_v59 = vadd.f32 %v998_v58, %v997_v56 }
 0x20f   : > { %v1000_v60 = vpop.f32.mrf.mxu1 }
 0x210   : > { %v746_v61 = vadd.f32 %v999_v59, %v1559_v51 }
 0x211   : > { %v1001_v62 = vpop.f32.mrf.mxu1 }
 0x212   : > { %802 = vst [vmem:[%s1564_s14 + $0x10] sm:$0xff] %v746_v61  ;;  %v1002_v1 = vadd.f32 %v1001_v62, %v1000_v60 }
 0x213   : > { %v1003_v2 = vpop.f32.mrf.mxu1 }
 0x214   : > { %v749_v3 = vadd.f32 %v1002_v1, %v1559_v51 }
 0x215   : > { %v1004_v4 = vpop.f32.mrf.mxu1 }
 0x216   : > { %803 = vst [vmem:[%s1564_s14 + $0x18] sm:$0xff] %v749_v3  ;;  %v1005_v5 = vadd.f32 %v1004_v4, %v1003_v2 }
 0x217   : > { %v1006_v6 = vpop.f32.mrf.mxu1 }
 0x218   : > { %v754_v7 = vadd.f32 %v1005_v5, %v1559_v51 }
 0x219   : > { %v1007_v8 = vpop.f32.mrf.mxu1 }
 0x21a   : > { %804 = vst [vmem:[%s1564_s14 + $0x20] sm:$0xff] %v754_v7  ;;  %v1008_v9 = vadd.f32 %v1007_v8, %v1006_v6 }
 0x21b   : > { %v1009_v10 = vpop.f32.mrf.mxu1 }
 0x21c   : > { %v757_v11 = vadd.f32 %v1008_v9, %v1559_v51 }
 0x21d   : > { %v1010_v12 = vpop.f32.mrf.mxu1 }
 0x21e   : > { %805 = vst [vmem:[%s1564_s14 + $0x28] sm:$0xff] %v757_v11  ;;  %v1011_v13 = vadd.f32 %v1010_v12, %v1009_v10 }
 0x21f   : > { %v1012_v14 = vpop.f32.mrf.mxu1 }
 0x220   : > { %v762_v15 = vadd.f32 %v1011_v13, %v1559_v51 }
 0x221   : > { %v1013_v16 = vpop.f32.mrf.mxu1 }
 0x222   : > { %806 = vst [vmem:[%s1564_s14 + $0x30] sm:$0xff] %v762_v15  ;;  %v1014_v17 = vadd.f32 %v1013_v16, %v1012_v14 }
 0x223   : > { %v1015_v18 = vpop.f32.mrf.mxu1 }
 0x224   : > { %v765_v19 = vadd.f32 %v1014_v17, %v1559_v51 }
 0x225   : > { %v1016_v20 = vpop.f32.mrf.mxu1 }
 0x226   : > { %807 = vst [vmem:[%s1564_s14 + $0x38] sm:$0xff] %v765_v19  ;;  %v1017_v21 = vadd.f32 %v1016_v20, %v1015_v18 }
 0x227   : > { %v1018_v22 = vpop.f32.mrf.mxu1 }
 0x228   : > { %v770_v23 = vadd.f32 %v1017_v21, %v1559_v51 }
 0x229   : > { %v1019_v24 = vpop.f32.mrf.mxu1 }
 0x22a   : > { %808 = vst [vmem:[%s1564_s14 + $0x40] sm:$0xff] %v770_v23  ;;  %v1020_v25 = vadd.f32 %v1019_v24, %v1018_v22 }
 0x22b   : > { %v1021_v26 = vpop.f32.mrf.mxu1 }
 0x22c   : > { %v773_v27 = vadd.f32 %v1020_v25, %v1559_v51 }
 0x22d   : > { %v1022_v28 = vpop.f32.mrf.mxu1 }
 0x22e   : > { %809 = vst [vmem:[%s1564_s14 + $0x48] sm:$0xff] %v773_v27  ;;  %v1023_v29 = vadd.f32 %v1022_v28, %v1021_v26 }
 0x22f   : > { %v1024_v30 = vpop.f32.mrf.mxu1 }
 0x230   : > { %v778_v31 = vadd.f32 %v1023_v29, %v1559_v51 }
 0x231   : > { %v1025_v32 = vpop.f32.mrf.mxu1 }
 0x232   : > { %810 = vst [vmem:[%s1564_s14 + $0x50] sm:$0xff] %v778_v31  ;;  %v1026_v33 = vadd.f32 %v1025_v32, %v1024_v30 }
 0x233   : > { %v1027_v34 = vpop.f32.mrf.mxu1 }
 0x234   : > { %v781_v35 = vadd.f32 %v1026_v33, %v1559_v51 }
 0x235   : > { %v1028_v36 = vpop.f32.mrf.mxu1 }
 0x236   : > { %811 = vst [vmem:[%s1564_s14 + $0x58] sm:$0xff] %v781_v35  ;;  %v1029_v37 = vadd.f32 %v1028_v36, %v1027_v34 }
 0x237   : > { %v1030_v38 = vpop.f32.mrf.mxu1 }
 0x238   : > { %v786_v39 = vadd.f32 %v1029_v37, %v1559_v51 }
 0x239   : > { %v1031_v40 = vpop.f32.mrf.mxu1 }
 0x23a   : > { %812 = vst [vmem:[%s1564_s14 + $0x60] sm:$0xff] %v786_v39  ;;  %v1032_v41 = vadd.f32 %v1031_v40, %v1030_v38 }
 0x23b   : > { %v1033_v42 = vpop.f32.mrf.mxu1 }
 0x23c   : > { %v789_v43 = vadd.f32 %v1032_v41, %v1559_v51 }
 0x23d   : > { %v1034_v44 = vpop.f32.mrf.mxu1 }
 0x23e   : > { %813 = vst [vmem:[%s1564_s14 + $0x68] sm:$0xff] %v789_v43  ;;  %v1035_v45 = vadd.f32 %v1034_v44, %v1033_v42 }
 0x23f   : > { %v1036_v46 = vpop.f32.mrf.mxu1 }
 0x240   : > { %v794_v47 = vadd.f32 %v1035_v45, %v1559_v51 }
 0x241   : > { %v1037_v48 = vpop.f32.mrf.mxu1 }
 0x242   : > { %814 = vst [vmem:[%s1564_s14 + $0x70] sm:$0xff] %v794_v47  ;;  %v1038_v49 = vadd.f32 %v1037_v48, %v1036_v46 }
 0x244   : > { %v797_v50 = vadd.f32 %v1038_v49, %v1559_v51 }
 0x246   : > { %815 = vst [vmem:[%s1564_s14 + $0x78] sm:$0xff] %v797_v50 }
 0x247   : > { %1246 = shalt.err (!%p1243_p3)
}
 0x248   : > { %s1247_s15 = scalar_lea.hbm %s1600_s13, 2048  ;;  %s1251_s9 = scalar_lea.hbm %s1652_s5, 4096 }
 0x249   : > { %p1248_p11 = scmp.ne.s32.totalorder %s1600_s13, %s1247_s15  ;;  %p1252_p4 = scmp.lt.s32.totalorder %s1600_s13, %s1652_s5 }
 0x24a   : > { %p1253_p6 = scmp.lt.s32.totalorder %s1251_s9, %s1247_s15 }
 0x24b   : > { %p1249_p9 = pnand %p1248_p11, %p1669_p2 }
 0x24c   : > { %p1254_p8 = por %p1253_p6, %p1252_p4 }
 0x24d   : > { %p1250_p1 = pneg %p1249_p9 }
 0x24f   : > { %p1255_p10 = pnand %p1254_p8, %p1250_p1 }
 0x251   : > { %1258 = shalt.err (!%p1255_p10)
}
 0x252   : > { %s1312_s16 = smov 128   ;;  %s1313_s11 = smov 8  }
 0x253   : > { %1049 = dma.vmem_to_hbm [thread:$0]  (%p1669_p2), %s1602_s10, 2048, %s1600_s13, %s817_s27, %s1312_s16, %s1312_s16, %s1313_s11  }
 0x254 PF: > { %s845_s29 = sand.u32 1, %s1289_s18   ;;  %p1670_p7 = scmp.ne.s32.totalorder %s1659_s25, 0 }
 0x255   : > { %p1671_p12 = scmp.ge.s32.totalorder %s1301_s21, 2  ;;  %s846_s23 = scalar_lea.sflag [#allocation4], %s845_s29 }
 0x257   : > { %p1063_p13 = pnand %p1671_p12, %p1670_p7 }
 0x259   : > { %p1064_p0 = pneg %p1063_p13 }
 0x25b   : > { %1284 = dma.done.wait (%p1064_p0), %s846_s23, 2048  }
 0x25c   : > { %1286 = vsyncadd (%p1064_p0), %s846_s23, 4294965248  ;;  %p19_p5 = scmp.ge.s32.totalorder %s1419_s17, 4   ;;  %s1672_s18 = smov %s1293_s19 }
 0x25d   : > { %s1673_s19 = smov %s1297_s20  ;;  %s1674_s20 = smov %s1428_s28 }
 0x25e   : > { %s1675_s21 = smov %s1419_s17  ;;  %21 = sbr.rel (!%p19_p5) target bundleno = 6 (0x6), region = 93 }
 0x263   :  { %851 = vsyncpa [#allocation3], 1 }
 0x264   :  { %853 = vsyncpa [#allocation3 + $0x1], 1 }
 0x265   :  { %854 = vsyncpa [#allocation6], 1 }
 0x266   :  { %855 = vsyncpa [#allocation4], 1 }
 0x267   :  { %857 = vsyncpa [#allocation4 + $0x1], 1 }

</bundles_post_ra>
